<compile_context>
chip_gen: v6e
topology: v6e:2x2x1
jax: 0.10.0
libtpu: 0.0.40
codegen_flags: <defaults>
</compile_context>

<pallas_src>
import jax
import jax.numpy as jnp
from jax.experimental import pallas as pl
from jax.experimental.pallas import tpu as pltpu


def _round_up(x, m):
    return ((x + m - 1) // m) * m


def _cdiv(a, b):
    return -(-a // b)


def _plan_batch(B, block_b):
    """Pick (TB, B_pad, ntiles): TB multiple of 8, >=2 grid steps when possible,
    and padding limited to ~8 rows per tile (never a full tile of junk)."""
    B8 = _round_up(B, 8)
    ntiles = max(1, _cdiv(B8, block_b))
    if B8 >= 16:
        ntiles = max(ntiles, 2)          # let v7x shard the batch over both TCs
    TB = _round_up(_cdiv(B8, ntiles), 8)
    B_pad = TB * ntiles
    return TB, B_pad, ntiles


# ----------------------------------------------------------------------------
# Kernel
# ----------------------------------------------------------------------------
def discrete_actor_kernel(x_ref, w1_ref, b1_ref, w2_ref, b2_ref,
                          w3_ref, b3_ref, out_ref):
    # x tile: (TB, state_dim), f32 or bf16 -> bf16 for the MXU; f32 accumulation.
    x = x_ref[...].astype(jnp.bfloat16)

    # Layer 1: Linear + ReLU
    h1 = jnp.dot(x, w1_ref[...], preferred_element_type=jnp.float32) + b1_ref[...]
    h1 = jnp.maximum(h1, 0.0)

    # Layer 2: Linear + ReLU
    h2 = jnp.dot(h1.astype(jnp.bfloat16), w2_ref[...],
                 preferred_element_type=jnp.float32) + b2_ref[...]
    h2 = jnp.maximum(h2, 0.0)

    # Layer 3: Linear -> logits (TB, A); A is the true number of actions.
    logits = jnp.dot(h2.astype(jnp.bfloat16), w3_ref[...],
                     preferred_element_type=jnp.float32) + b3_ref[...]

    # LogSoftmax over dim=1 (last axis), numerically stable, all in f32.
    m = jnp.max(logits, axis=-1, keepdims=True)
    shifted = logits - m
    lse = jnp.log(jnp.sum(jnp.exp(shifted), axis=-1, keepdims=True))
    out_ref[...] = (shifted - lse).astype(out_ref.dtype)


# ----------------------------------------------------------------------------
# One-time parameter preparation (hoisted out of the per-call forward)
# ----------------------------------------------------------------------------
def prepare_discrete_actor_params(w1, b1, w2, b2, w3, b3):
    """Call ONCE at module init.

    Weights are expected transposed ([in_features, out_features]).  Returns
    materialized, kernel-ready params: bf16 weights (half the HBM weight DMA,
    native MXU path) and f32 row-vector biases.
    """
    params = (
        jnp.asarray(w1, jnp.bfloat16),
        jnp.asarray(b1, jnp.float32).reshape(1, -1),
        jnp.asarray(w2, jnp.bfloat16),
        jnp.asarray(b2, jnp.float32).reshape(1, -1),
        jnp.asarray(w3, jnp.bfloat16),
        jnp.asarray(b3, jnp.float32).reshape(1, -1),
    )
    # Materialize now so no cast/reshape op runs on the per-forward hot path.
    return jax.block_until_ready(params)


# ----------------------------------------------------------------------------
# Forward wrapper
# ----------------------------------------------------------------------------
def discrete_actor_forward(state, params, *, block_b=1024):
    """state: [B, state_dim] (f32 or bf16). params: from prepare_discrete_actor_params."""
    w1b, b1f, w2b, b2f, w3b, b3f = params
    B, state_dim = state.shape
    A = w3b.shape[1]

    TB, B_pad, ntiles = _plan_batch(B, block_b)

    x = state
    if B_pad != B:
        # Only the small 8/ntiles-row remainder gets padded (never a full tile).
        x = jnp.pad(x, ((0, B_pad - B), (0, 0)))

    def resident(shape):
        # Whole-array block, same block index every grid step -> stays VMEM-resident
        # across the batch loop (no re-DMA of weights per tile).
        return pl.BlockSpec(shape, lambda i: tuple(0 for _ in shape))

    out = pl.pallas_call(
        discrete_actor_kernel,
        out_shape=jax.ShapeDtypeStruct((B_pad, A), jnp.float32),
        grid_spec=pl.GridSpec(
            grid=(ntiles,),
            in_specs=[
                pl.BlockSpec((TB, state_dim), lambda i: (i, 0)),
                resident(w1b.shape), resident(b1f.shape),
                resident(w2b.shape), resident(b2f.shape),
                resident(w3b.shape), resident(b3f.shape),
            ],
            # Unpadded, lane-narrow output block: A equals the full last dim, so
            # this is legal; it cuts HBM writeback 16x vs. a 128-lane padded slab.
            out_specs=pl.BlockSpec((TB, A), lambda i: (i, 0)),
        ),
        compiler_params=pltpu.CompilerParams(
            dimension_semantics=("parallel",),     # shard batch tiles over v7x's 2 TCs
            vmem_limit_bytes=32 * 1024 * 1024,
        ),
    )(x, w1b, b1f, w2b, b2f, w3b, b3f)

    return out[:B]


# ----------------------------------------------------------------------------
# Init helper + self-test
# ----------------------------------------------------------------------------
def init_linear_params(key, fan_in, fan_out):
    # Deterministic init mimicking PyTorch nn.Linear default:
    # U(-1/sqrt(fan_in), 1/sqrt(fan_in)) for both weight and bias.
    kw, kb = jax.random.split(key)
    bound = 1.0 / jnp.sqrt(float(fan_in))
    # Stored transposed: [in_features, out_features]
    w = jax.random.uniform(kw, (fan_in, fan_out), jnp.float32, -bound, bound)
    b = jax.random.uniform(kb, (1, fan_out), jnp.float32, -bound, bound)
    return w, b


if __name__ == "__main__":
    # Small shapes consistent with the module: state_dim=32, num_of_action=8
    batch = 8
    state_dim = 32
    num_of_action = 8
    hidden = 256

    key = jax.random.PRNGKey(0)
    k_x, k1, k2, k3 = jax.random.split(key, 4)

    state = jax.random.normal(k_x, (batch, state_dim), jnp.float32)
    w1, b1 = init_linear_params(k1, state_dim, hidden)
    w2, b2 = init_linear_params(k2, hidden, hidden)
    w3, b3 = init_linear_params(k3, hidden, num_of_action)

    # One-time prep (hoisted out of the forward hot path).
    params = prepare_discrete_actor_params(w1, b1, w2, b2, w3, b3)

    log_prob = discrete_actor_forward(state, params)
    log_prob = jax.block_until_ready(log_prob)

    # Pure-JAX reference with the same bf16 weight quantization + f32 accumulation.
    def ref_forward(x):
        h1 = jnp.maximum(
            jnp.dot(x.astype(jnp.bfloat16), w1.astype(jnp.bfloat16),
                    preferred_element_type=jnp.float32) + b1, 0.0)
        h2 = jnp.maximum(
            jnp.dot(h1.astype(jnp.bfloat16), w2.astype(jnp.bfloat16),
                    preferred_element_type=jnp.float32) + b2, 0.0)
        logits = jnp.dot(h2.astype(jnp.bfloat16), w3.astype(jnp.bfloat16),
                         preferred_element_type=jnp.float32) + b3
        return jax.nn.log_softmax(logits, axis=1)

    ref = ref_forward(state)

    assert log_prob.shape == (batch, num_of_action)
    assert jnp.allclose(log_prob, ref, atol=1e-3, rtol=1e-3), \
        float(jnp.max(jnp.abs(log_prob - ref)))
    # Log-probs must sum (in prob space) to ~1 per row
    assert jnp.allclose(jnp.sum(jnp.exp(log_prob), axis=1), 1.0, atol=1e-4)

    # Exercise an "awkward" batch size once to sanity-check the tiling plan
    # (>=2 grid steps, uneven remainder padded only to the next 8/tile boundary).
    big_state = jax.random.normal(k_x, (37, state_dim), jnp.float32)
    big_out = jax.block_until_ready(discrete_actor_forward(big_state, params))
    assert big_out.shape == (37, num_of_action)
    assert jnp.allclose(jnp.sum(jnp.exp(big_out), axis=1), 1.0, atol=1e-4)

    print("KERNEL_OK")
</pallas_src>

<mosaic_0001>
module attributes {stable_mosaic.version = 11 : i64} {
  func.func @discrete_actor_kernel(%arg0: i32, %arg1: memref<8x32xf32, #tpu.memory_space<vmem>>, %arg2: memref<32x256xbf16, #tpu.memory_space<vmem>>, %arg3: memref<1x256xf32, #tpu.memory_space<vmem>>, %arg4: memref<256x256xbf16, #tpu.memory_space<vmem>>, %arg5: memref<1x256xf32, #tpu.memory_space<vmem>>, %arg6: memref<256x8xbf16, #tpu.memory_space<vmem>>, %arg7: memref<1x8xf32, #tpu.memory_space<vmem>>, %arg8: memref<8x8xf32, #tpu.memory_space<vmem>>) attributes {dimension_semantics = [#tpu.dimension_semantics<parallel>], iteration_bounds = array<i64: 1>, scalar_prefetch = 0 : i64, scratch_operands = 0 : i64, tpu.core_type = #tpu.core_type<tc>, window_params = [{transform_indices = @transform_0, window_bounds = array<i64: 8, 32>}, {pipeline_mode = #tpu.pipeline_mode<synchronous>, transform_indices = @transform_1, window_bounds = array<i64: 32, 256>}, {pipeline_mode = #tpu.pipeline_mode<synchronous>, transform_indices = @transform_2, window_bounds = array<i64: 1, 256>}, {pipeline_mode = #tpu.pipeline_mode<synchronous>, transform_indices = @transform_3, window_bounds = array<i64: 256, 256>}, {pipeline_mode = #tpu.pipeline_mode<synchronous>, transform_indices = @transform_4, window_bounds = array<i64: 1, 256>}, {pipeline_mode = #tpu.pipeline_mode<synchronous>, transform_indices = @transform_5, window_bounds = array<i64: 256, 8>}, {pipeline_mode = #tpu.pipeline_mode<synchronous>, transform_indices = @transform_6, window_bounds = array<i64: 1, 8>}, {transform_indices = @transform_7, window_bounds = array<i64: 8, 8>}]} {
    %c0 = arith.constant 0 : index
    %c0_0 = arith.constant 0 : index
    %0 = vector.load %arg1[%c0, %c0_0] : memref<8x32xf32, #tpu.memory_space<vmem>>, vector<8x32xf32>
    %1 = arith.truncf %0 : vector<8x32xf32> to vector<8x32xbf16>
    %c0_1 = arith.constant 0 : index
    %c0_2 = arith.constant 0 : index
    %2 = vector.load %arg2[%c0_1, %c0_2] : memref<32x256xbf16, #tpu.memory_space<vmem>>, vector<32x256xbf16>
    %cst = arith.constant dense<0.000000e+00> : vector<8x256xf32>
    %3 = tpu.matmul %1, %2, %cst {dimension_numbers = #tpu.dot_dimension_numbers<[1], [0], [0], [1], [0, 0, 1, 1], [], []>} : vector<8x32xbf16>, vector<32x256xbf16>, vector<8x256xf32> -> vector<8x256xf32>
    %c0_3 = arith.constant 0 : index
    %c0_4 = arith.constant 0 : index
    %4 = vector.load %arg3[%c0_3, %c0_4] : memref<1x256xf32, #tpu.memory_space<vmem>>, vector<1x256xf32>
    %5 = vector.broadcast %4 : vector<1x256xf32> to vector<8x256xf32>
    %6 = arith.addf %3, %5 : vector<8x256xf32>
    %cst_5 = arith.constant 0.000000e+00 : f32
    %7 = vector.broadcast %cst_5 : f32 to vector<8x256xf32>
    %8 = arith.maximumf %6, %7 : vector<8x256xf32>
    %9 = arith.truncf %8 : vector<8x256xf32> to vector<8x256xbf16>
    %c0_6 = arith.constant 0 : index
    %c0_7 = arith.constant 0 : index
    %10 = vector.load %arg4[%c0_6, %c0_7] : memref<256x256xbf16, #tpu.memory_space<vmem>>, vector<256x256xbf16>
    %cst_8 = arith.constant dense<0.000000e+00> : vector<8x256xf32>
    %11 = tpu.matmul %9, %10, %cst_8 {dimension_numbers = #tpu.dot_dimension_numbers<[1], [0], [0], [1], [0, 0, 1, 1], [], []>} : vector<8x256xbf16>, vector<256x256xbf16>, vector<8x256xf32> -> vector<8x256xf32>
    %c0_9 = arith.constant 0 : index
    %c0_10 = arith.constant 0 : index
    %12 = vector.load %arg5[%c0_9, %c0_10] : memref<1x256xf32, #tpu.memory_space<vmem>>, vector<1x256xf32>
    %13 = vector.broadcast %12 : vector<1x256xf32> to vector<8x256xf32>
    %14 = arith.addf %11, %13 : vector<8x256xf32>
    %cst_11 = arith.constant 0.000000e+00 : f32
    %15 = vector.broadcast %cst_11 : f32 to vector<8x256xf32>
    %16 = arith.maximumf %14, %15 : vector<8x256xf32>
    %17 = arith.truncf %16 : vector<8x256xf32> to vector<8x256xbf16>
    %c0_12 = arith.constant 0 : index
    %c0_13 = arith.constant 0 : index
    %18 = vector.load %arg6[%c0_12, %c0_13] : memref<256x8xbf16, #tpu.memory_space<vmem>>, vector<256x8xbf16>
    %cst_14 = arith.constant dense<0.000000e+00> : vector<8x8xf32>
    %19 = tpu.matmul %17, %18, %cst_14 {dimension_numbers = #tpu.dot_dimension_numbers<[1], [0], [0], [1], [0, 0, 1, 1], [], []>} : vector<8x256xbf16>, vector<256x8xbf16>, vector<8x8xf32> -> vector<8x8xf32>
    %c0_15 = arith.constant 0 : index
    %c0_16 = arith.constant 0 : index
    %20 = vector.load %arg7[%c0_15, %c0_16] : memref<1x8xf32, #tpu.memory_space<vmem>>, vector<1x8xf32>
    %21 = vector.broadcast %20 : vector<1x8xf32> to vector<8x8xf32>
    %22 = arith.addf %19, %21 : vector<8x8xf32>
    %cst_17 = arith.constant dense<0xFF800000> : vector<8xf32>
    %23 = vector.multi_reduction <maximumf>, %22, %cst_17 [1] : vector<8x8xf32> to vector<8xf32>
    %24 = vector.shape_cast %23 : vector<8xf32> to vector<8x1xf32>
    %25 = vector.broadcast %24 : vector<8x1xf32> to vector<8x8xf32>
    %26 = arith.subf %22, %25 : vector<8x8xf32>
    %27 = math.exp %26 : vector<8x8xf32>
    %cst_18 = arith.constant dense<0.000000e+00> : vector<8xf32>
    %28 = vector.multi_reduction <add>, %27, %cst_18 [1] : vector<8x8xf32> to vector<8xf32>
    %29 = vector.shape_cast %28 : vector<8xf32> to vector<8x1xf32>
    %30 = math.log %29 : vector<8x1xf32>
    %31 = vector.broadcast %30 : vector<8x1xf32> to vector<8x8xf32>
    %32 = arith.subf %26, %31 : vector<8x8xf32>
    %c0_19 = arith.constant 0 : index
    %c0_20 = arith.constant 0 : index
    %33 = vector.load %arg8[%c0_19, %c0_20] : memref<8x8xf32, #tpu.memory_space<vmem>>, vector<8x8xf32>
    tpu.vector_store %arg8[%c0_19, %c0_20], %32 {strides = array<i32>} : memref<8x8xf32, #tpu.memory_space<vmem>>, vector<8x8xf32>,
    return
  }
  func.func @transform_0(%arg0: i32) -> (i32, i32) {
    %c0_i32 = arith.constant 0 : i32
    %c0_i32_0 = arith.constant 0 : i32
    return %arg0, %c0_i32 : i32, i32
  }
  func.func @transform_1(%arg0: i32) -> (i32, i32) {
    %c0_i32 = arith.constant 0 : i32
    %c0_i32_0 = arith.constant 0 : i32
    %c0_i32_1 = arith.constant 0 : i32
    return %c0_i32, %c0_i32_0 : i32, i32
  }
  func.func @transform_2(%arg0: i32) -> (i32, i32) {
    %c0_i32 = arith.constant 0 : i32
    %c0_i32_0 = arith.constant 0 : i32
    %c0_i32_1 = arith.constant 0 : i32
    return %c0_i32, %c0_i32_0 : i32, i32
  }
  func.func @transform_3(%arg0: i32) -> (i32, i32) {
    %c0_i32 = arith.constant 0 : i32
    %c0_i32_0 = arith.constant 0 : i32
    %c0_i32_1 = arith.constant 0 : i32
    return %c0_i32, %c0_i32_0 : i32, i32
  }
  func.func @transform_4(%arg0: i32) -> (i32, i32) {
    %c0_i32 = arith.constant 0 : i32
    %c0_i32_0 = arith.constant 0 : i32
    %c0_i32_1 = arith.constant 0 : i32
    return %c0_i32, %c0_i32_0 : i32, i32
  }
  func.func @transform_5(%arg0: i32) -> (i32, i32) {
    %c0_i32 = arith.constant 0 : i32
    %c0_i32_0 = arith.constant 0 : i32
    %c0_i32_1 = arith.constant 0 : i32
    return %c0_i32, %c0_i32_0 : i32, i32
  }
  func.func @transform_6(%arg0: i32) -> (i32, i32) {
    %c0_i32 = arith.constant 0 : i32
    %c0_i32_0 = arith.constant 0 : i32
    %c0_i32_1 = arith.constant 0 : i32
    return %c0_i32, %c0_i32_0 : i32, i32
  }
  func.func @transform_7(%arg0: i32) -> (i32, i32) {
    %c0_i32 = arith.constant 0 : i32
    %c0_i32_0 = arith.constant 0 : i32
    return %arg0, %c0_i32 : i32, i32
  }
}

</mosaic_0001>

<bundles_post_ra>
// kernel: tpu_custom_call.1
= control target key start
LH: loop header
LB: loop body
LE: loop exit
PB: predicated region body
PF: predicated region fallthrough
CT: control target
= control target key end

     0   :  { %12 = vsyncpa [#allocation3], 0  ;;  %s907_s0 = inlined_call_operand.vmem [shape: f32[8,32], index: 0, kind: input, shape index: {}]   ;;  %s908_s1 = inlined_call_operand.vmem [shape: bf16[32,256], index: 1, kind: input, shape index: {}]   ;;  %s909_s2 = inlined_call_operand.vmem [shape: f32[1,256], index: 2, kind: input, shape index: {}]   ;;  %s910_s3 = inlined_call_operand.hbm [shape: bf16[256,256], index: 3, kind: input, shape index: {}]   ;;  %s911_s4 = inlined_call_operand.vmem [shape: f32[1,256], index: 4, kind: input, shape index: {}]   ;;  %s912_s5 = inlined_call_operand.vmem [shape: bf16[256,8], index: 5, kind: input, shape index: {}]   ;;  %s913_s6 = inlined_call_operand.vmem [shape: f32[1,8], index: 6, kind: input, shape index: {}]   ;;  %s914_s7 = inlined_call_operand.hbm [shape: f32[8,8], index: 7, kind: output, shape index: {}]  }
   0x1   :  { %13 = vsyncpa [#allocation4], 0  ;;  %s781_s24 = smov [#allocation2]  }
   0x2   :  { %s25_s25 = sshll.u32 %s781_s24, 4  ;;  %s26_s25 = int_to_ptr.vmem [resolvable:$true] %s25_s25 }
   0x3   :  { %s745_s26 = scalar_lea.vmem %s26_s25, 4096  ;;  %p750_p1 = scmp.lt.s32.totalorder %s26_s25, %s26_s25 }
   0x4   :  { %p746_p0 = scmp.ne.s32.totalorder %s26_s25, %s745_s26  ;;  %p751_p2 = scmp.lt.s32.totalorder %s745_s26, %s745_s26 }
   0x6   :  { %p752_p3 = por %p751_p2, %p750_p1 }
   0x8   :  { %p753_p4 = pnand %p752_p3, %p746_p0 }
   0xa   :  { %756 = shalt.err (!%p753_p4)
}
   0xb   :  { %s782_s27 = smov 128   ;;  %s783_s28 = smov 8  }
   0xc   :  { %31 = dma.hbm_to_vmem [thread:$0]  %s910_s3, 4096, %s26_s25, [#allocation3], %s782_s27, %s782_s27, %s783_s28  }
   0xd   :  { %777 = dma.done.wait [#allocation3], 4096  }
   0xe   :  { %778 = vsyncadd [#allocation3], 4294963200  ;;  %v784_v0 = vmov 0   ;;  %v663_v1 = vld [vmem:[%s908_s1 + $0x14] ss:$8 sps:$4 sm:$0xff]   ;;  %v42_v5 = vld [vmem:[%s907_s0] sm:$0xff]  ;;  %v50_v51 = vlaneseq }
   0xf   :  { %116 = vmatprep.mubr.bf16.mxu0 %v784_v0  ;;  %v665_v2 = vld [vmem:[%s908_s1 + $0x10] ss:$8 sps:$4 sm:$0xff]   ;;  %96 = vmatprep.subr.bf16.mxu0 %v663_v1  ;;  %v666_v3 = vld [vmem:[%s908_s1 + $0x4] ss:$8 sps:$4 sm:$0xff]   ;;  %v668_v4 = vld [vmem:[%s908_s1] ss:$8 sps:$4 sm:$0xff]   ;;  %v43_v9 = vpack.c.bf16 %v42_v5, %v42_v5 }
  0x10   :  { %97 = vmatpush1.bf16.msra.mxu0 %v665_v2  ;;  %v669_v6 = vld [vmem:[#allocation2 + $0x74] ss:$8 sps:$4 sm:$0xff]   ;;  %v671_v7 = vld [vmem:[#allocation2 + $0x70] ss:$8 sps:$4 sm:$0xff]   ;;  %v672_v8 = vld [vmem:[#allocation2 + $0x64] ss:$8 sps:$4 sm:$0xff]  }
  0x11   :  { %98 = vmatprep.subr.bf16.mxu0 %v666_v3  ;;  %333 = vmatprep.subr.bf16.mxu1 %v669_v6  ;;  %v674_v10 = vld [vmem:[#allocation2 + $0x60] ss:$8 sps:$4 sm:$0xff]   ;;  %vm80_vm0 = vcmask 261120   ;;  %v675_v11 = vld [vmem:[#allocation2 + $0x54] ss:$8 sps:$4 sm:$0xff]   ;;  %v51_v52 = vshrl.u32 %v50_v51, 7 }
  0x12   :  { %334 = vmatpush1.bf16.msra.mxu1 %v671_v7  ;;  %v677_v12 = vld [vmem:[#allocation2 + $0x50] ss:$8 sps:$4 sm:$0xff]   ;;  %v678_v13 = vld [vmem:[#allocation2 + $0x44] ss:$8 sps:$4 sm:$0xff]   ;;  %v680_v14 = vld [vmem:[#allocation2 + $0x40] ss:$8 sps:$4 sm:$0xff]  }
  0x13   :  { %335 = vmatprep.subr.bf16.mxu1 %v672_v8  ;;  %v681_v15 = vld [vmem:[#allocation2 + $0x34] ss:$8 sps:$4 sm:$0xff]   ;;  %v683_v16 = vld [vmem:[#allocation2 + $0x30] ss:$8 sps:$4 sm:$0xff]   ;;  %v684_v17 = vld [vmem:[#allocation2 + $0x24] ss:$8 sps:$4 sm:$0xff]  }
  0x14   :  { %99 = vmatpush1.bf16.msra.mxu0 %v668_v4  ;;  %v686_v18 = vld [vmem:[#allocation2 + $0x20] ss:$8 sps:$4 sm:$0xff]   ;;  %v687_v19 = vld [vmem:[#allocation2 + $0x14] ss:$8 sps:$4 sm:$0xff]   ;;  %v689_v20 = vld [vmem:[#allocation2 + $0x10] ss:$8 sps:$4 sm:$0xff]  }
  0x15   :  { %v690_v21 = vld [vmem:[#allocation2 + $0x4] ss:$8 sps:$4 sm:$0xff]   ;;  %v692_v22 = vld [vmem:[#allocation2] ss:$8 sps:$4 sm:$0xff]   ;;  %v693_v23 = vld [vmem:[#allocation2 + $0xf4] ss:$8 sps:$4 sm:$0xff]  }
  0x16   :  { %336 = vmatpush1.bf16.msra.mxu1 %v674_v10  ;;  %v695_v24 = vld [vmem:[#allocation2 + $0xf0] ss:$8 sps:$4 sm:$0xff]   ;;  %v696_v25 = vld [vmem:[#allocation2 + $0xe4] ss:$8 sps:$4 sm:$0xff]   ;;  %v698_v26 = vld [vmem:[#allocation2 + $0xe0] ss:$8 sps:$4 sm:$0xff]  }
  0x17   :  { %586 = vmatmul.mubr.msk.bf16.vlgmr.msra.gmra.mxu0 %vm80_vm0, %v43_v9  ;;  %337 = vmatprep.subr.bf16.mxu1 %v675_v11  ;;  %v699_v27 = vld [vmem:[#allocation2 + $0xd4] ss:$8 sps:$4 sm:$0xff]   ;;  %v701_v28 = vld [vmem:[#allocation2 + $0xd0] ss:$8 sps:$4 sm:$0xff]   ;;  %v702_v29 = vld [vmem:[#allocation2 + $0xc4] ss:$8 sps:$4 sm:$0xff]  }
  0x18   :  { %v704_v30 = vld [vmem:[#allocation2 + $0xc0] ss:$8 sps:$4 sm:$0xff]   ;;  %v705_v31 = vld [vmem:[#allocation2 + $0xb4] ss:$8 sps:$4 sm:$0xff]   ;;  %v707_v32 = vld [vmem:[#allocation2 + $0xb0] ss:$8 sps:$4 sm:$0xff]  }
  0x19   :  { %v708_v33 = vld [vmem:[#allocation2 + $0xa4] ss:$8 sps:$4 sm:$0xff]   ;;  %v710_v34 = vld [vmem:[#allocation2 + $0xa0] ss:$8 sps:$4 sm:$0xff]   ;;  %v711_v35 = vld [vmem:[#allocation2 + $0x94] ss:$8 sps:$4 sm:$0xff]  }
  0x1a   :  { %338 = vmatpush1.bf16.msra.mxu1 %v677_v12  ;;  %v713_v36 = vld [vmem:[#allocation2 + $0x90] ss:$8 sps:$4 sm:$0xff]   ;;  %v714_v37 = vld [vmem:[#allocation2 + $0x84] ss:$8 sps:$4 sm:$0xff]   ;;  %v716_v38 = vld [vmem:[#allocation2 + $0x80] ss:$8 sps:$4 sm:$0xff]  }
  0x1b   :  { %339 = vmatprep.subr.bf16.mxu1 %v678_v13  ;;  %v717_v39 = vld [vmem:[%s912_s5 + $0x78] sm:$0xff]   ;;  %v719_v41 = vld [vmem:[%s912_s5 + $0x70] sm:$0xff]   ;;  %v721_v43 = vld [vmem:[%s912_s5 + $0x68] sm:$0xff]   ;;  %v52_v53 = vsub.s32 0, %v51_v52  ;;  %v56_v55 = vsub.s32 1, %v51_v52  ;;  %vm553_vm1 = vcmask 64512  }
  0x1c   :  { %v718_v40 = vld [vmem:[%s912_s5 + $0x38] sm:$0xff]   ;;  %636 = vmatprep.subr.bf16.mxu0 %v717_v39  ;;  %v720_v42 = vld [vmem:[%s912_s5 + $0x30] sm:$0xff]   ;;  %v722_v44 = vld [vmem:[%s912_s5 + $0x28] sm:$0xff]  }
  0x1d   :  { %637 = vmatpush3.bf16.msra.mxu0 %v718_v40  ;;  %v723_v45 = vld [vmem:[%s912_s5 + $0x60] sm:$0xff]   ;;  %v725_v47 = vld [vmem:[%s912_s5 + $0x58] sm:$0xff]   ;;  %v727_v49 = vld [vmem:[%s912_s5 + $0x50] sm:$0xff]  }
  0x1e   :  { %340 = vmatpush1.bf16.msra.mxu1 %v680_v14  ;;  %638 = vmatprep.subr.bf16.mxu0 %v719_v41  ;;  %v724_v46 = vld [vmem:[%s912_s5 + $0x20] sm:$0xff]   ;;  %v726_v48 = vld [vmem:[%s912_s5 + $0x18] sm:$0xff]   ;;  %v728_v50 = vld [vmem:[%s912_s5 + $0x10] sm:$0xff]  }
  0x1f   :  { %341 = vmatprep.subr.bf16.mxu1 %v681_v15  ;;  %v48_v54 = vld [vmem:[%s909_s2] sm:$0x3]  ;;  %v729_v4 = vld [vmem:[%s912_s5 + $0x48] sm:$0xff]  }
  0x20   :  { %v53_v56 = vrot.slane %v48_v54, %v52_v53  ;;  %v57_v57 = vrot.slane %v48_v54, %v56_v55  ;;  %v730_v5 = vld [vmem:[%s912_s5 + $0x8] sm:$0xff]   ;;  %v731_v6 = vld [vmem:[%s912_s5 + $0x40] sm:$0xff]  }
  0x21   :  { %639 = vmatpush3.bf16.msra.mxu0 %v720_v42  ;;  %v732_v7 = vld [vmem:[%s912_s5] sm:$0xff]  }
  0x22   :  { %342 = vmatpush1.bf16.msra.mxu1 %v683_v16  ;;  %640 = vmatprep.subr.bf16.mxu0 %v721_v43  ;;  %v161_v8 = vld [vmem:[%s911_s4] sm:$0x3]  ;;  %s785_s4 = smov [#allocation5]  }
  0x23   :  { %343 = vmatprep.subr.bf16.mxu1 %v684_v17  ;;  %v166_v9 = vrot.slane %v161_v8, %v52_v53  ;;  %v170_v10 = vrot.slane %v161_v8, %v56_v55 }
  0x25   :  { %641 = vmatpush3.bf16.msra.mxu0 %v722_v44 }
  0x26   :  { %344 = vmatpush1.bf16.msra.mxu1 %v686_v18  ;;  %642 = vmatprep.subr.bf16.mxu0 %v723_v45 }
  0x27   :  { %345 = vmatprep.subr.bf16.mxu1 %v687_v19 }
  0x29   :  { %643 = vmatpush3.bf16.msra.mxu0 %v724_v46 }
  0x2a   :  { %346 = vmatpush1.bf16.msra.mxu1 %v689_v20  ;;  %644 = vmatprep.subr.bf16.mxu0 %v725_v47 }
  0x2b   :  { %347 = vmatprep.subr.bf16.mxu1 %v690_v21 }
  0x2d   :  { %645 = vmatpush3.bf16.msra.mxu0 %v726_v48 }
  0x2e   :  { %348 = vmatpush1.bf16.msra.mxu1 %v692_v22  ;;  %646 = vmatprep.subr.bf16.mxu0 %v727_v49 }
  0x2f   :  { %349 = vmatprep.subr.bf16.mxu1 %v693_v23  ;;  %v619_v23 = vld [vmem:[%s913_s6] ss:$0 sm:$0xff]  ;;  %s573_s6 = sshll.u32 %s785_s4, 4  ;;  %s574_s6 = int_to_ptr.vmem [resolvable:$true] %s573_s6 }
  0x30   :  { %s757_s25 = scalar_lea.vmem %s574_s6, 128  ;;  %p762_p6 = scmp.lt.s32.totalorder %s574_s6, %s574_s6 }
  0x31   :  { %647 = vmatpush3.bf16.msra.mxu0 %v728_v50  ;;  %p758_p5 = scmp.ne.s32.totalorder %s574_s6, %s757_s25  ;;  %p763_p7 = scmp.lt.s32.totalorder %s757_s25, %s757_s25 }
  0x32   :  { %350 = vmatpush2.bf16.msra.mxu1 %v695_v24  ;;  %648 = vmatprep.subr.bf16.mxu0 %v729_v4 }
  0x33   :  { %351 = vmatprep.subr.bf16.mxu1 %v696_v25  ;;  %p764_p8 = por %p763_p7, %p762_p6 }
  0x35   :  { %649 = vmatpush3.bf16.msra.mxu0 %v730_v5  ;;  %p765_p9 = pnand %p764_p8, %p758_p5 }
  0x36   :  { %352 = vmatpush2.bf16.msra.mxu1 %v698_v26  ;;  %650 = vmatprep.subr.bf16.mxu0 %v731_v6 }
  0x37   :  { %353 = vmatprep.subr.bf16.mxu1 %v699_v27 }
  0x39   :  { %651 = vmatpush3.bf16.msra.mxu0 %v732_v7 }
  0x3a   :  { %354 = vmatpush2.bf16.msra.mxu1 %v701_v28 }
  0x3b   :  { %355 = vmatprep.subr.bf16.mxu1 %v702_v29 }
  0x3e   :  { %356 = vmatpush2.bf16.msra.mxu1 %v704_v30 }
  0x3f   :  { %357 = vmatprep.subr.bf16.mxu1 %v705_v31 }
  0x42   :  { %358 = vmatpush2.bf16.msra.mxu1 %v707_v32 }
  0x43   :  { %359 = vmatprep.subr.bf16.mxu1 %v708_v33 }
  0x46   :  { %360 = vmatpush2.bf16.msra.mxu1 %v710_v34 }
  0x47   :  { %361 = vmatprep.subr.bf16.mxu1 %v711_v35 }
  0x4a   :  { %362 = vmatpush2.bf16.msra.mxu1 %v713_v36 }
  0x4b   :  { %363 = vmatprep.subr.bf16.mxu1 %v714_v37 }
  0x4e   :  { %364 = vmatpush2.bf16.msra.mxu1 %v716_v38 }
  0xd7   :  { %v118_v58 = vpop.f32.mrf.mxu0 }
  0xd8   :  { %v119_v59 = vadd.f32 %v118_v58, %v53_v56 }
  0xd9   :  { %v120_v60 = vpop.f32.mrf.mxu0 }
  0xda   :  { %v121_v61 = vadd.f32 %v120_v60, %v57_v57  ;;  %v125_v62 = vmax.f32 %v119_v59, 0.0 }
  0xdb   :  { %v122_v63 = vpop.f32.mrf.mxu0 }
  0xdc   :  { %v126_v0 = vmax.f32 %v121_v61, 0.0  ;;  %v127_v3 = vpack.c.bf16 %v125_v62, %v125_v62 }
  0xdd   :  { %v123_v1 = vpop.f32.mrf.mxu0 }
  0xde   :  { %v128_v2 = vpack.c.bf16 %v126_v0, %v126_v0 }
  0xe0   :  { %365 = vmatprep.mubr.bf16.mxu1 %v128_v2 }
  0xe1   :  { %366 = vmatmul.mubr.bf16.vlgmr.msra.gmra.mxu1 %v127_v3 }
 0x1a1   :  { %v367_v11 = vpop.f32.mrf.mxu1 }
 0x1a2   :  { %v368_v12 = vadd.f32 %v367_v11, %v166_v9 }
 0x1a3   :  { %v369_v13 = vpop.f32.mrf.mxu1 }
 0x1a4   :  { %v370_v14 = vadd.f32 %v369_v13, %v170_v10  ;;  %v374_v15 = vmax.f32 %v368_v12, 0.0 }
 0x1a5   :  { %v371_v16 = vpop.f32.mrf.mxu1 }
 0x1a6   :  { %v375_v17 = vmax.f32 %v370_v14, 0.0  ;;  %v376_v20 = vpack.c.bf16 %v374_v15, %v374_v15 }
 0x1a7   :  { %v372_v18 = vpop.f32.mrf.mxu1 }
 0x1a8   :  { %v377_v19 = vpack.c.bf16 %v375_v17, %v375_v17 }
 0x1aa   :  { %545 = vmatprep.mubr.bf16.mxu0 %v377_v19 }
 0x1ab   :  { %546 = vmatmul.mubr.bf16.vlgmr.msra.gmra.mxu0 %v376_v20 }
 0x26b   :  { %v652_v21 = vpop.f32.mrf.mxu0 }
 0x26d   :  { %v653_v22 = vpop.f32.mrf.mxu0 }
 0x26e   :  { %v654_v24 = vadd.f32 %v653_v22, %v652_v21 }
 0x26f   :  { %v655_v25 = vpop.f32.mrf.mxu0 }
 0x270   :  { %v548_v26 = vadd.f32 %v654_v24, %v619_v23 }
 0x271   :  { %v656_v27 = vpop.f32.mrf.mxu0 }
 0x272   :  { %v554_v28 = vsel %vm553_vm1, %v548_v26, -inf }
 0x273   :  { %555 = vmax.xlane.f32.xlu0 %v554_v28 }
 0x2fc   :  { %v556_v29 = vpop.xlane.xlu0 %555 }
 0x2fd   :  { %v557_v30 = vsub.f32 %v548_v26, %v556_v29 }
 0x2ff   :  { %v558_v31 = vmul.f32 1.442695, %v557_v30 }
 0x301   :  { %733 = vpow2.f32 %v558_v31 }
 0x30e   :  { %v734_v32 = vpop.eup %733 }
 0x30f   :  { %v560_v33 = vsel %vm553_vm1, %v734_v32, 0.0 }
 0x310   :  { %561 = vadd.xlane.f32.xlu0 %v560_v33 }
 0x399   :  { %v562_v34 = vpop.xlane.xlu0 %561 }
 0x39a   :  { %735 = vlog2.f32 %v562_v34 }
 0x3a7   :  { %v736_v35 = vpop.eup %735 }
 0x3a8   :  { %v564_v36 = vmul.f32 0.6931472, %v736_v35 }
 0x3aa   :  { %v565_v37 = vsub.f32 %v557_v30, %v564_v36 }
 0x3ac   :  { %566 = vst.msk [vmem:[#allocation5] sm:$0xff] %vm553_vm1, %v565_v37 }
 0x3ad   :  { %768 = shalt.err (!%p765_p9)
}
 0x3ae   :  { %576 = dma.vmem_to_hbm [thread:$0]  %s574_s6, 128, %s914_s7, [#allocation4]  }
 0x3af   :  { %779 = dma.done.wait [#allocation4], 128  }
 0x3b0   :  { %780 = vsyncadd [#allocation4], 4294967168 }
 0x3b1   :  { %580 = vsyncpa [#allocation3], 1 }
 0x3b2   :  { %581 = vsyncpa [#allocation4], 1 }

</bundles_post_ra>
